<compile_context>
chip_gen: v6e
topology: v6e:2x2x1
jax: 0.10.0
libtpu: 0.0.40
codegen_flags: <defaults>
</compile_context>

<pallas_src>
import jax
import jax.numpy as jnp
from jax.experimental import pallas as pl
from jax.experimental.pallas import tpu as pltpu

OUT_DIM = 4
OUT_PAD = 128   # lane-dense padded output width


def decoder_kernel(z_ref,
                   w1_ref, b1_ref,
                   w2_ref, b2_ref,
                   w3_ref, b3_ref,
                   w4p_ref, b4p_ref,
                   out_ref):
    # fc1 + ReLU  (bf16 x bf16 -> f32 accumulate on the MXU)
    h = jnp.dot(z_ref[...], w1_ref[...], preferred_element_type=jnp.float32)
    h = jnp.maximum(h + b1_ref[...], 0.0)
    # fc2 + ReLU (weights resident in VMEM, f32)
    h = jnp.dot(h, w2_ref[...], preferred_element_type=jnp.float32)
    h = jnp.maximum(h + b2_ref[...], 0.0)
    # fc3 + ReLU
    h = jnp.dot(h, w3_ref[...], preferred_element_type=jnp.float32)
    h = jnp.maximum(h + b3_ref[...], 0.0)
    # fc4 (no activation) -- weight/bias zero-padded to 128 lanes so the store
    # of the output slab is unmasked / lane-dense.
    h = jnp.dot(h, w4p_ref[...], preferred_element_type=jnp.float32)
    out_ref[...] = (h + b4p_ref[...]).astype(out_ref.dtype)


def decoder_forward(z, params, *, max_tile=1024):
    """z: [B, 128 + noise_dim] float32. params: dict of w1..w4, b1..b4 (f32)."""
    B, in_dim = z.shape

    # bf16 cast of the streamed input + first-layer weight (f32 accumulation in kernel).
    z_bf = z.astype(jnp.bfloat16)
    w1 = params["w1"].astype(jnp.bfloat16)
    b1 = params["b1"]
    w2, b2 = params["w2"], params["b2"]
    w3, b3 = params["w3"], params["b3"]
    w4, b4 = params["w4"], params["b4"]

    # Zero-pad fc4 to a 128-wide output so the final store is lane-dense.
    w4p = jnp.zeros((w4.shape[0], OUT_PAD), jnp.float32).at[:, :OUT_DIM].set(w4)
    b4p = jnp.zeros((1, OUT_PAD), jnp.float32).at[:, :OUT_DIM].set(b4)

    # Batch tile: large enough to amortize the ~0.35us/step overhead, small enough
    # to fit comfortably in every generation's VMEM (incl. v7x's 64 MiB physical):
    # per-step live buffers at TB=1024: 2 x (1024*144*2B) z + 2 x (1024*128*4B) out
    # + weights  ~ 1.7 MiB.
    TB = B if B <= max_tile else max_tile
    grid = (pl.cdiv(B, TB),)

    full = lambda arr: pl.BlockSpec(arr.shape, lambda i: (0,) * arr.ndim)

    flops = 2 * B * (in_dim * 64 + 64 * 32 + 32 * 16 + 16 * OUT_DIM)
    bytes_accessed = (B * in_dim * 2            # bf16 z stream
                      + B * OUT_PAD * 4         # padded f32 output writeback
                      + in_dim * 64 * 2         # w1 (bf16)
                      + (64 * 32 + 32 * 16 + 16 * OUT_PAD) * 4  # w2..w4p (f32)
                      + (64 + 32 + 16 + OUT_PAD) * 4)           # biases

    out_padded = pl.pallas_call(
        decoder_kernel,
        out_shape=jax.ShapeDtypeStruct((B, OUT_PAD), jnp.float32),
        grid=grid,
        in_specs=[pl.BlockSpec((TB, in_dim), lambda i: (i, 0)),
                  full(w1), full(b1),
                  full(w2), full(b2),
                  full(w3), full(b3),
                  full(w4p), full(b4p)],
        out_specs=pl.BlockSpec((TB, OUT_PAD), lambda i: (i, 0)),
        compiler_params=pltpu.CompilerParams(
            dimension_semantics=("parallel",)),
        cost_estimate=pl.CostEstimate(flops=flops,
                                      transcendentals=0,
                                      bytes_accessed=bytes_accessed),
    )(z_bf, w1, b1, w2, b2, w3, b3, w4p, b4p)

    return out_padded[:, :OUT_DIM]


def init_params(noise_dim, key, mean=0.0, std=0.02):
    """Deterministic normal init (weights ~ N(mean, std), biases = 0),
    mirroring the module's weight_init(mean, std) convention."""
    dims = [128 + noise_dim, 64, 32, 16, OUT_DIM]
    params = {}
    keys = jax.random.split(key, 4)
    for i in range(4):
        in_d, out_d = dims[i], dims[i + 1]
        # stored as [in, out] (transposed vs. PyTorch's [out, in])
        w = mean + std * jax.random.normal(keys[i], (in_d, out_d), dtype=jnp.float32)
        b = jnp.zeros((1, out_d), dtype=jnp.float32)  # 2-D for TPU lane layout
        params[f"w{i+1}"] = w
        params[f"b{i+1}"] = b
    return params


def decoder_ref(z, params):
    """Plain-JAX reference of the PyTorch forward pass, using the same bf16
    rounding of z/w1 that the kernel applies (f32 accumulation everywhere)."""
    z32 = z.astype(jnp.bfloat16).astype(jnp.float32)
    w1 = params["w1"].astype(jnp.bfloat16).astype(jnp.float32)
    h = jax.nn.relu(z32 @ w1 + params["b1"])
    h = jax.nn.relu(h @ params["w2"] + params["b2"])
    h = jax.nn.relu(h @ params["w3"] + params["b3"])
    return h @ params["w4"] + params["b4"]


if __name__ == "__main__":
    noise_dim = 16          # small synthetic choice
    batch = 8
    in_dim = 128 + noise_dim

    key = jax.random.PRNGKey(0)
    k_params, k_z = jax.random.split(key)
    params = init_params(noise_dim, k_params)
    z = jax.random.normal(k_z, (batch, in_dim), dtype=jnp.float32)

    out = decoder_forward(z, params)
    out = jax.block_until_ready(out)

    ref = decoder_ref(z, params)
    assert out.shape == (batch, OUT_DIM)
    assert jnp.allclose(out, ref, atol=1e-3, rtol=1e-3), "mismatch vs reference"

    print("KERNEL_OK")
</pallas_src>

<mosaic_0001>
module attributes {stable_mosaic.version = 11 : i64} {
  func.func @decoder_kernel(%arg0: i32, %arg1: memref<8x144xbf16, #tpu.memory_space<vmem>>, %arg2: memref<144x64xbf16, #tpu.memory_space<vmem>>, %arg3: memref<1x64xf32, #tpu.memory_space<vmem>>, %arg4: memref<64x32xf32, #tpu.memory_space<vmem>>, %arg5: memref<1x32xf32, #tpu.memory_space<vmem>>, %arg6: memref<32x16xf32, #tpu.memory_space<vmem>>, %arg7: memref<1x16xf32, #tpu.memory_space<vmem>>, %arg8: memref<16x128xf32, #tpu.memory_space<vmem>>, %arg9: memref<1x128xf32, #tpu.memory_space<vmem>>, %arg10: memref<8x128xf32, #tpu.memory_space<vmem>>) attributes {dimension_semantics = [#tpu.dimension_semantics<parallel>], iteration_bounds = array<i64: 1>, scalar_prefetch = 0 : i64, scratch_operands = 0 : i64, tpu.core_type = #tpu.core_type<tc>, window_params = [{transform_indices = @transform_0, window_bounds = array<i64: 8, 144>}, {pipeline_mode = #tpu.pipeline_mode<synchronous>, transform_indices = @transform_1, window_bounds = array<i64: 144, 64>}, {pipeline_mode = #tpu.pipeline_mode<synchronous>, transform_indices = @transform_2, window_bounds = array<i64: 1, 64>}, {pipeline_mode = #tpu.pipeline_mode<synchronous>, transform_indices = @transform_3, window_bounds = array<i64: 64, 32>}, {pipeline_mode = #tpu.pipeline_mode<synchronous>, transform_indices = @transform_4, window_bounds = array<i64: 1, 32>}, {pipeline_mode = #tpu.pipeline_mode<synchronous>, transform_indices = @transform_5, window_bounds = array<i64: 32, 16>}, {pipeline_mode = #tpu.pipeline_mode<synchronous>, transform_indices = @transform_6, window_bounds = array<i64: 1, 16>}, {pipeline_mode = #tpu.pipeline_mode<synchronous>, transform_indices = @transform_7, window_bounds = array<i64: 16, 128>}, {pipeline_mode = #tpu.pipeline_mode<synchronous>, transform_indices = @transform_8, window_bounds = array<i64: 1, 128>}, {transform_indices = @transform_9, window_bounds = array<i64: 8, 128>}]} {
    %c0 = arith.constant 0 : index
    %c0_0 = arith.constant 0 : index
    %0 = vector.load %arg1[%c0, %c0_0] : memref<8x144xbf16, #tpu.memory_space<vmem>>, vector<8x144xbf16>
    %c0_1 = arith.constant 0 : index
    %c0_2 = arith.constant 0 : index
    %1 = vector.load %arg2[%c0_1, %c0_2] : memref<144x64xbf16, #tpu.memory_space<vmem>>, vector<144x64xbf16>
    %cst = arith.constant dense<0.000000e+00> : vector<8x64xf32>
    %2 = tpu.matmul %0, %1, %cst {dimension_numbers = #tpu.dot_dimension_numbers<[1], [0], [0], [1], [0, 0, 1, 1], [], []>} : vector<8x144xbf16>, vector<144x64xbf16>, vector<8x64xf32> -> vector<8x64xf32>
    %c0_3 = arith.constant 0 : index
    %c0_4 = arith.constant 0 : index
    %3 = vector.load %arg3[%c0_3, %c0_4] : memref<1x64xf32, #tpu.memory_space<vmem>>, vector<1x64xf32>
    %4 = vector.broadcast %3 : vector<1x64xf32> to vector<8x64xf32>
    %5 = arith.addf %2, %4 : vector<8x64xf32>
    %cst_5 = arith.constant 0.000000e+00 : f32
    %6 = vector.broadcast %cst_5 : f32 to vector<8x64xf32>
    %7 = arith.maximumf %5, %6 : vector<8x64xf32>
    %c0_6 = arith.constant 0 : index
    %c0_7 = arith.constant 0 : index
    %8 = vector.load %arg4[%c0_6, %c0_7] : memref<64x32xf32, #tpu.memory_space<vmem>>, vector<64x32xf32>
    %cst_8 = arith.constant dense<0.000000e+00> : vector<8x32xf32>
    %9 = tpu.matmul %7, %8, %cst_8 {dimension_numbers = #tpu.dot_dimension_numbers<[1], [0], [0], [1], [0, 0, 1, 1], [], []>} : vector<8x64xf32>, vector<64x32xf32>, vector<8x32xf32> -> vector<8x32xf32>
    %c0_9 = arith.constant 0 : index
    %c0_10 = arith.constant 0 : index
    %10 = vector.load %arg5[%c0_9, %c0_10] : memref<1x32xf32, #tpu.memory_space<vmem>>, vector<1x32xf32>
    %11 = vector.broadcast %10 : vector<1x32xf32> to vector<8x32xf32>
    %12 = arith.addf %9, %11 : vector<8x32xf32>
    %cst_11 = arith.constant 0.000000e+00 : f32
    %13 = vector.broadcast %cst_11 : f32 to vector<8x32xf32>
    %14 = arith.maximumf %12, %13 : vector<8x32xf32>
    %c0_12 = arith.constant 0 : index
    %c0_13 = arith.constant 0 : index
    %15 = vector.load %arg6[%c0_12, %c0_13] : memref<32x16xf32, #tpu.memory_space<vmem>>, vector<32x16xf32>
    %cst_14 = arith.constant dense<0.000000e+00> : vector<8x16xf32>
    %16 = tpu.matmul %14, %15, %cst_14 {dimension_numbers = #tpu.dot_dimension_numbers<[1], [0], [0], [1], [0, 0, 1, 1], [], []>} : vector<8x32xf32>, vector<32x16xf32>, vector<8x16xf32> -> vector<8x16xf32>
    %c0_15 = arith.constant 0 : index
    %c0_16 = arith.constant 0 : index
    %17 = vector.load %arg7[%c0_15, %c0_16] : memref<1x16xf32, #tpu.memory_space<vmem>>, vector<1x16xf32>
    %18 = vector.broadcast %17 : vector<1x16xf32> to vector<8x16xf32>
    %19 = arith.addf %16, %18 : vector<8x16xf32>
    %cst_17 = arith.constant 0.000000e+00 : f32
    %20 = vector.broadcast %cst_17 : f32 to vector<8x16xf32>
    %21 = arith.maximumf %19, %20 : vector<8x16xf32>
    %c0_18 = arith.constant 0 : index
    %c0_19 = arith.constant 0 : index
    %22 = vector.load %arg8[%c0_18, %c0_19] : memref<16x128xf32, #tpu.memory_space<vmem>>, vector<16x128xf32>
    %cst_20 = arith.constant dense<0.000000e+00> : vector<8x128xf32>
    %23 = tpu.matmul %21, %22, %cst_20 {dimension_numbers = #tpu.dot_dimension_numbers<[1], [0], [0], [1], [0, 0, 1, 1], [], []>} : vector<8x16xf32>, vector<16x128xf32>, vector<8x128xf32> -> vector<8x128xf32>
    %c0_21 = arith.constant 0 : index
    %c0_22 = arith.constant 0 : index
    %24 = vector.load %arg9[%c0_21, %c0_22] : memref<1x128xf32, #tpu.memory_space<vmem>>, vector<1x128xf32>
    %25 = vector.broadcast %24 : vector<1x128xf32> to vector<8x128xf32>
    %26 = arith.addf %23, %25 : vector<8x128xf32>
    %c0_23 = arith.constant 0 : index
    %c0_24 = arith.constant 0 : index
    %27 = vector.load %arg10[%c0_23, %c0_24] : memref<8x128xf32, #tpu.memory_space<vmem>>, vector<8x128xf32>
    tpu.vector_store %arg10[%c0_23, %c0_24], %26 {strides = array<i32>} : memref<8x128xf32, #tpu.memory_space<vmem>>, vector<8x128xf32>,
    return
  }
  func.func @transform_0(%arg0: i32) -> (i32, i32) {
    %c0_i32 = arith.constant 0 : i32
    %c0_i32_0 = arith.constant 0 : i32
    return %arg0, %c0_i32 : i32, i32
  }
  func.func @transform_1(%arg0: i32) -> (i32, i32) {
    %c0_i32 = arith.constant 0 : i32
    %c0_i32_0 = arith.constant 0 : i32
    %c0_i32_1 = arith.constant 0 : i32
    return %c0_i32, %c0_i32_0 : i32, i32
  }
  func.func @transform_2(%arg0: i32) -> (i32, i32) {
    %c0_i32 = arith.constant 0 : i32
    %c0_i32_0 = arith.constant 0 : i32
    %c0_i32_1 = arith.constant 0 : i32
    return %c0_i32, %c0_i32_0 : i32, i32
  }
  func.func @transform_3(%arg0: i32) -> (i32, i32) {
    %c0_i32 = arith.constant 0 : i32
    %c0_i32_0 = arith.constant 0 : i32
    %c0_i32_1 = arith.constant 0 : i32
    return %c0_i32, %c0_i32_0 : i32, i32
  }
  func.func @transform_4(%arg0: i32) -> (i32, i32) {
    %c0_i32 = arith.constant 0 : i32
    %c0_i32_0 = arith.constant 0 : i32
    %c0_i32_1 = arith.constant 0 : i32
    return %c0_i32, %c0_i32_0 : i32, i32
  }
  func.func @transform_5(%arg0: i32) -> (i32, i32) {
    %c0_i32 = arith.constant 0 : i32
    %c0_i32_0 = arith.constant 0 : i32
    %c0_i32_1 = arith.constant 0 : i32
    return %c0_i32, %c0_i32_0 : i32, i32
  }
  func.func @transform_6(%arg0: i32) -> (i32, i32) {
    %c0_i32 = arith.constant 0 : i32
    %c0_i32_0 = arith.constant 0 : i32
    %c0_i32_1 = arith.constant 0 : i32
    return %c0_i32, %c0_i32_0 : i32, i32
  }
  func.func @transform_7(%arg0: i32) -> (i32, i32) {
    %c0_i32 = arith.constant 0 : i32
    %c0_i32_0 = arith.constant 0 : i32
    %c0_i32_1 = arith.constant 0 : i32
    return %c0_i32, %c0_i32_0 : i32, i32
  }
  func.func @transform_8(%arg0: i32) -> (i32, i32) {
    %c0_i32 = arith.constant 0 : i32
    %c0_i32_0 = arith.constant 0 : i32
    %c0_i32_1 = arith.constant 0 : i32
    return %c0_i32, %c0_i32_0 : i32, i32
  }
  func.func @transform_9(%arg0: i32) -> (i32, i32) {
    %c0_i32 = arith.constant 0 : i32
    %c0_i32_0 = arith.constant 0 : i32
    return %arg0, %c0_i32 : i32, i32
  }
}

</mosaic_0001>

<bundles_post_ra>
// kernel: tpu_custom_call.1
= control target key start
LH: loop header
LB: loop body
LE: loop exit
PB: predicated region body
PF: predicated region fallthrough
CT: control target
= control target key end

     0   :  { %v548_v1 = vmov 0   ;;  %v549_v3 = vmov 0.0   ;;  %vm120_vm0 = vcmask 130048   ;;  %s711_s0 = inlined_call_operand.vmem [shape: bf16[8,144], index: 0, kind: input, shape index: {}]   ;;  %s712_s1 = inlined_call_operand.vmem [shape: bf16[144,64], index: 1, kind: input, shape index: {}]   ;;  %s713_s2 = inlined_call_operand.vmem [shape: f32[1,64], index: 2, kind: input, shape index: {}]   ;;  %s714_s3 = inlined_call_operand.vmem [shape: f32[64,32], index: 3, kind: input, shape index: {}]   ;;  %s715_s4 = inlined_call_operand.vmem [shape: f32[1,32], index: 4, kind: input, shape index: {}]   ;;  %s716_s5 = inlined_call_operand.vmem [shape: f32[32,16], index: 5, kind: input, shape index: {}]   ;;  %s717_s6 = inlined_call_operand.vmem [shape: f32[1,16], index: 6, kind: input, shape index: {}]   ;;  %s718_s7 = inlined_call_operand.vmem [shape: f32[16,128], index: 7, kind: input, shape index: {}]   ;;  %s719_s8 = inlined_call_operand.vmem [shape: f32[1,128], index: 8, kind: input, shape index: {}]   ;;  %s720_s9 = inlined_call_operand.hbm [shape: f32[8,128], index: 9, kind: output, shape index: {}]  }
   0x1   :  { %v515_v0 = vld [vmem:[%s712_s1 + $0x38] sm:$0xff]   ;;  %124 = vmatprep.subr.bf16.mxu0 %v548_v1  ;;  %v516_v2 = vld [vmem:[%s712_s1 + $0x30] sm:$0xff]   ;;  %474 = vmatprep.subr.mxu1 %v549_v3  ;;  %v517_v4 = vld [vmem:[%s712_s1 + $0x28] sm:$0xff]  }
   0x2   :  { %125 = vmatpush1.bf16.msra.mxu0 %v515_v0  ;;  %v34_v5 = vld [vmem:[%s711_s0] sm:$0xff]  ;;  %v172_v6 = vld [vmem:[%s714_s3 + $0x38] sm:$0xff]  ;;  %v171_v7 = vld [vmem:[%s714_s3 + $0x30] sm:$0xff] }
   0x3   :  { %126 = vmatprep.subr.bf16.mxu0 %v548_v1  ;;  %v518_v8 = vld [vmem:[%s712_s1 + $0x20] sm:$0xff]   ;;  %v440_v9 = vcombine.high %v34_v5, %v34_v5  ;;  %475 = vmatpush3.msra.mxu1 %v172_v6  ;;  %v170_v10 = vld [vmem:[%s714_s3 + $0x28] sm:$0xff] }
   0x4   :  { %476 = vmatprep.subr.mxu1 %v549_v3 }
   0x6   :  { %127 = vmatpush1.bf16.msra.mxu0 %v516_v2 }
   0x7   :  { %128 = vmatprep.subr.bf16.mxu0 %v548_v1 }
   0xa   :  { %129 = vmatpush1.bf16.msra.mxu0 %v517_v4 }
   0xb   :  { %130 = vmatprep.subr.bf16.mxu0 %v548_v1 }
   0xc   :  { %14 = vsyncpa [#allocation3], 0  ;;  %450 = vmatprep.mubr.msk.bf16.mxu0 %vm120_vm0, %v440_v9  ;;  %477 = vmatpush3.msra.mxu1 %v171_v7  ;;  %v169_v11 = vld [vmem:[%s714_s3 + $0x20] sm:$0xff]  ;;  %v519_v12 = vld [vmem:[%s712_s1 + $0x18] sm:$0xff]   ;;  %v439_v18 = vcombine.low %v34_v5, %v34_v5  ;;  %vm550_vm1 = vmmov 0   ;;  %vm180_vm2 = vcmask 523264  }
   0xd   :  { %478 = vmatprep.subr.mxu1 %v549_v3  ;;  %v168_v13 = vld [vmem:[%s714_s3 + $0x18] sm:$0xff]  ;;  %v520_v14 = vld [vmem:[%s712_s1 + $0x10] sm:$0xff]   ;;  %v521_v15 = vld [vmem:[%s712_s1 + $0x8] sm:$0xff]   ;;  %490 = vmatprep.mubr.msk.f32.mxu1 %vm550_vm1, %v549_v3  ;;  %vm266_vm3 = vcmask 261120   ;;  %s551_s16 = smov [#allocation2]  }
   0xe   :  { %131 = vmatpush1.bf16.msra.mxu0 %v518_v8  ;;  %479 = vmatpush3.msra.mxu1 %v170_v10  ;;  %v522_v16 = vld [vmem:[%s712_s1] sm:$0xff]   ;;  %v167_v19 = vld [vmem:[%s714_s3 + $0x10] sm:$0xff]  ;;  %v166_v20 = vld [vmem:[%s714_s3 + $0x8] sm:$0xff]  ;;  %s430_s17 = sshll.u32 %s551_s16, 4  ;;  %s431_s17 = int_to_ptr.vmem [resolvable:$true] %s430_s17 }
   0xf   :  { %132 = vmatprep.subr.bf16.mxu0 %v548_v1  ;;  %480 = vmatprep.subr.mxu1 %v549_v3  ;;  %v523_v17 = vld [vmem:[%s712_s1 + $0x40] sm:$0xff]   ;;  %v258_v27 = vld [vmem:[%s716_s5 + $0x18] sm:$0xff]  ;;  %v257_v30 = vld [vmem:[%s716_s5 + $0x10] sm:$0xff]  ;;  %p531_p1 = scmp.lt.s32.totalorder %s431_s17, %s431_s17 }
  0x10   :  { %481 = vmatpush3.msra.mxu1 %v169_v11  ;;  %v165_v21 = vld [vmem:[%s714_s3] sm:$0xff]  ;;  %v256_v31 = vld [vmem:[%s716_s5 + $0x8] sm:$0xff] }
  0x11   :  { %482 = vmatprep.subr.mxu1 %v549_v3  ;;  %v438_v22 = vld [vmem:[%s713_s2] ss:$0 sm:$0xff]  ;;  %v342_v38 = vld [vmem:[%s718_s7 + $0x8] sm:$0xff] }
  0x12   :  { %133 = vmatpush1.bf16.msra.mxu0 %v519_v12  ;;  %483 = vmatpush3.msra.mxu1 %v168_v13  ;;  %v255_v32 = vld [vmem:[%s716_s5] sm:$0xff] }
  0x13   :  { %134 = vmatprep.subr.bf16.mxu0 %v548_v1  ;;  %484 = vmatprep.subr.mxu1 %v549_v3  ;;  %v451_v33 = vld [vmem:[%s715_s4] ss:$0 sm:$0xff] }
  0x14   :  { %485 = vmatpush3.msra.mxu1 %v167_v19  ;;  %v341_v39 = vld [vmem:[%s718_s7] sm:$0xff]  ;;  %s526_s7 = scalar_lea.vmem %s431_s17, 128 }
  0x15   :  { %486 = vmatprep.subr.mxu1 %v549_v3  ;;  %v453_v40 = vld [vmem:[%s717_s6] ss:$0 sm:$0xff]  ;;  %p527_p0 = scmp.ne.s32.totalorder %s431_s17, %s526_s7  ;;  %p532_p2 = scmp.lt.s32.totalorder %s526_s7, %s526_s7 }
  0x16   :  { %135 = vmatpush1.bf16.msra.mxu0 %v520_v14  ;;  %487 = vmatpush3.msra.mxu1 %v166_v20  ;;  %v455_v45 = vld [vmem:[%s719_s8] ss:$0 sm:$0xff] }
  0x17   :  { %136 = vmatprep.subr.bf16.mxu0 %v548_v1  ;;  %488 = vmatprep.subr.mxu1 %v549_v3  ;;  %p533_p3 = por %p532_p2, %p531_p1 }
  0x18   :  { %489 = vmatpush3.msra.mxu1 %v165_v21 }
  0x19   :  { %493 = vmatprep.subr.mxu1 %v549_v3  ;;  %p534_p4 = pnand %p533_p3, %p527_p0 }
  0x1a   :  { %137 = vmatpush1.bf16.msra.mxu0 %v521_v15 }
  0x1b   :  { %138 = vmatprep.subr.bf16.mxu0 %v548_v1 }
  0x1e   :  { %139 = vmatpush1.bf16.msra.mxu0 %v522_v16 }
  0x1f   :  { %154 = vmatprep.subr.bf16.mxu0 %v548_v1 }
  0x22   :  { %155 = vmatpush2.bf16.msra.mxu0 %v523_v17 }
  0x25   :  { %157 = vmatmul.mubr.bf16.vlgmr.msra.gmra.mxu0 %v439_v18 }
  0xe5   :  { %v158_v23 = vpop.f32.mrf.mxu0 }
  0xe6   :  { %v159_v24 = vadd.f32 %v438_v22, %v158_v23 }
  0xe7   :  { %v160_v25 = vpop.f32.mrf.mxu0 }
  0xe8   :  { %v164_v26 = vmax.f32 %v159_v24, 0.0 }
  0xe9   :  { %v161_v28 = vpop.f32.mrf.mxu0 }
  0xea   :  { %491 = vmatmul.mubr.msk.f32.vlgmr.msra.gmra.mxu1 %vm180_vm2, %v164_v26 }
  0xeb   :  { %v162_v29 = vpop.f32.mrf.mxu0  ;;  %494 = vmatpush3.msra.mxu1 %v258_v27  ;;  %501 = vmatprep.mubr.msk.f32.mxu1 %vm550_vm1, %v549_v3 }
  0xec   :  { %495 = vmatprep.subr.mxu1 %v549_v3 }
  0xed   :  { %496 = vmatpush3.msra.mxu1 %v257_v30 }
  0xee   :  { %497 = vmatprep.subr.mxu1 %v549_v3 }
  0xef   :  { %498 = vmatpush3.msra.mxu1 %v256_v31 }
  0xf0   :  { %499 = vmatprep.subr.mxu1 %v549_v3 }
  0xf1   :  { %500 = vmatpush3.msra.mxu1 %v255_v32 }
  0xf2   :  { %504 = vmatprep.subr.mxu1 %v549_v3 }
 0x1aa   :  { %v250_v34 = vpop.f32.mrf.mxu1 }
 0x1ab   :  { %v251_v35 = vadd.f32 %v451_v33, %v250_v34 }
 0x1ac   :  { %v492_v36 = vpop.f32.mrf.mxu1 }
 0x1ad   :  { %v254_v37 = vmax.f32 %v251_v35, 0.0 }
 0x1af   :  { %502 = vmatmul.mubr.msk.f32.vlgmr.msra.gmra.mxu1 %vm266_vm3, %v254_v37 }
 0x1b0   :  { %508 = vmatprep.mubr.msk.f32.mxu1 %vm550_vm1, %v549_v3  ;;  %505 = vmatpush3.msra.mxu1 %v342_v38 }
 0x1b1   :  { %506 = vmatprep.subr.mxu1 %v549_v3 }
 0x1b2   :  { %507 = vmatpush3.msra.mxu1 %v341_v39 }
 0x26f   :  { %v336_v41 = vpop.f32.mrf.mxu1 }
 0x270   :  { %v337_v42 = vadd.f32 %v453_v40, %v336_v41 }
 0x271   :  { %v503_v43 = vpop.f32.mrf.mxu1 }
 0x272   :  { %v340_v44 = vmax.f32 %v337_v42, 0.0 }
 0x274   :  { %509 = vmatmul.mubr.msk.f32.vlgmr.msra.gmra.mxu1 %vm120_vm0, %v340_v44 }
 0x334   :  { %v419_v46 = vpop.f32.mrf.mxu1 }
 0x335   :  { %v420_v47 = vadd.f32 %v455_v45, %v419_v46 }
 0x336   :  { %v510_v48 = vpop.f32.mrf.mxu1 }
 0x337   :  { %423 = vst [vmem:[#allocation2] sm:$0xff] %v420_v47 }
 0x338   :  { %537 = shalt.err (!%p534_p4)
}
 0x339   :  { %433 = dma.vmem_to_hbm [thread:$0]  %s431_s17, 128, %s720_s9, [#allocation3]  }
 0x33a   :  { %546 = dma.done.wait [#allocation3], 128  }
 0x33b   :  { %547 = vsyncadd [#allocation3], 4294967168 }
 0x33c   :  { %437 = vsyncpa [#allocation3], 1 }

</bundles_post_ra>
